<compile_context>
chip_gen: v6e
topology: v6e:2x2x1
jax: 0.10.0
libtpu: 0.0.40
codegen_flags: <defaults>
</compile_context>

<pallas_src>
import functools

import jax
import jax.numpy as jnp
from jax.experimental import pallas as pl
from jax.experimental.pallas import tpu as pltpu

_LANE = 128
# lanes per grid step: (2+1)*4 B/lane = ~3 MB/step, ~7 MB with double-buffering
# -> fits comfortably under scoped-VMEM defaults on v5e/v6e/v7x.
_MAX_BLOCK_B = 256 * 1024


def _round_up(x, n):
    return ((x + n - 1) // n) * n


def _static_pow(x, g):
    """x ** g with g a *static* Python float, specialized at trace time."""
    if g == 0.0:
        return jnp.ones_like(x)
    if float(int(g)) == float(g) and 0 < int(g) <= 4:
        r = x
        for _ in range(int(g) - 1):
            r = r * x
        return r
    # General (non-integer) exponent: guard x == 0 so 0**g -> 0, never NaN.
    return jnp.where(x > 0.0, jnp.exp(g * jnp.log(jnp.maximum(x, 1e-30))), 0.0)


def asl_kernel(x_ref, t_ref, o_ref, acc_ref, *, m, gm, gp, batch, block_b,
               tiles_per_partial):
    t_idx = pl.program_id(1)

    @pl.when(t_idx == 0)
    def _init():
        acc_ref[...] = jnp.zeros_like(acc_ref)

    x0 = x_ref[0:1, :]            # (1, block_b) logits, class 0
    x1 = x_ref[1:2, :]            # (1, block_b) logits, class 1
    t0 = t_ref[...]               # (1, block_b) target in {0, 1} (f32)
    t1 = 1.0 - t0

    # Binary softmax, analytically: p1 = sigmoid(d), p0 = sigmoid(-d),
    # log(p0) = -softplus(d).  One exp + one log + one divide per element.
    d = x1 - x0
    e = jnp.exp(-jnp.abs(d))
    inv = 1.0 / (1.0 + e)
    p1 = jnp.where(d >= 0.0, inv, e * inv)                 # sigmoid(d)
    p0 = 1.0 - p1                                          # sigmoid(-d)
    softplus_d = jnp.maximum(d, 0.0) + jnp.log(1.0 + e)    # = -log(p0), finite

    # positive term: -t0 * p1**gp * log(p0)  ==  t0 * p1**gp * softplus(d)
    lossp = t0 * _static_pow(p1, gp) * softplus_d
    lossp = jnp.where(t0 > 0.0, lossp, 0.0)

    # negative (shifted) term: -t1 * pm0**gm * log(1 - pm0)
    pm0 = jnp.maximum(p0 - m, 0.0)
    lossm = -t1 * _static_pow(pm0, gm) * jnp.log(1.0 - pm0)
    lossm = jnp.where(t1 > 0.0, lossm, 0.0)                # avoid 0 * inf -> NaN

    # Mask batch padding and accumulate elementwise into the resident scratch
    # (single cross-lane XLU reduce deferred to the epilogue).
    start = (pl.program_id(0) * tiles_per_partial + t_idx) * block_b
    idx = start + jax.lax.broadcasted_iota(jnp.int32, (1, block_b), 1)
    acc_ref[...] += jnp.where(idx < batch, lossp + lossm, 0.0)

    @pl.when(t_idx == pl.num_programs(1) - 1)
    def _finalize():
        partial = jnp.sum(acc_ref[...])
        o_ref[...] = partial * jnp.ones((1, _LANE), jnp.float32)


def asl_loss(logits, target, *, m=0.0, gm=0.0, gp=0.0, num_partials=2):
    """logits: (B, 2) float, target: (B,) int in {0,1}. Returns scalar f32."""
    B, C = logits.shape
    assert C == 2, "ASL kernel assumes binary classification (C == 2)"

    block_b = min(_MAX_BLOCK_B, _round_up(B, 4 * _LANE))
    b_pad = _round_up(B, block_b * num_partials)
    num_tiles = b_pad // block_b
    tiles_per_partial = num_tiles // num_partials

    # Lane-dense layout: classes on sublanes, batch on lanes (layout plumbing).
    x_t = jnp.zeros((2, b_pad), jnp.float32)
    x_t = x_t.at[:, :B].set(jnp.transpose(logits.astype(jnp.float32)))
    t_t = jnp.zeros((1, b_pad), jnp.float32)
    t_t = t_t.at[:, :B].set(target.astype(jnp.float32)[None, :])

    kernel = functools.partial(
        asl_kernel, m=float(m), gm=float(gm), gp=float(gp), batch=B,
        block_b=block_b, tiles_per_partial=tiles_per_partial)

    out = pl.pallas_call(
        kernel,
        out_shape=jax.ShapeDtypeStruct((1, num_partials * _LANE), jnp.float32),
        grid_spec=pltpu.PrefetchScalarGridSpec(
            num_scalar_prefetch=0,
            grid=(num_partials, tiles_per_partial),
            in_specs=[
                pl.BlockSpec((2, block_b),
                             lambda p, t, tp=tiles_per_partial: (0, p * tp + t)),
                pl.BlockSpec((1, block_b),
                             lambda p, t, tp=tiles_per_partial: (0, p * tp + t)),
            ],
            out_specs=pl.BlockSpec((1, _LANE), lambda p, t: (0, p)),
            scratch_shapes=[pltpu.VMEM((1, block_b), jnp.float32)],
        ),
        compiler_params=pltpu.CompilerParams(
            dimension_semantics=("parallel", "arbitrary"),
            vmem_limit_bytes=32 * 1024 * 1024,
        ),
    )(x_t, t_t)

    partials = out.reshape(num_partials, _LANE)[:, 0]
    return jnp.sum(partials) / B


def asl_reference(logits, target, *, m=0.0, gm=0.0, gp=0.0):
    """Pure-JAX reference mirroring the PyTorch forward."""
    p = jax.nn.softmax(logits.astype(jnp.float32), axis=1)
    t0 = target.astype(jnp.float32)
    t1 = 1.0 - t0
    lossp = jnp.sum(-t0 * (p[:, 1] ** gp) * jnp.log(p[:, 0]))
    pm0 = jnp.maximum(p[:, 0] - m, 0.0)
    pm1 = 1.0 - pm0
    lossm = jnp.sum(-t1 * (pm0 ** gm) * jnp.log(pm1))
    return (lossp + lossm) / logits.shape[0]


if __name__ == "__main__":
    key = jax.random.PRNGKey(0)
    k1, k2 = jax.random.split(key)
    B, C = 8, 2
    logits = jax.random.normal(k1, (B, C), dtype=jnp.float32)
    target = jax.random.randint(k2, (B,), 0, 2, dtype=jnp.int32)

    # Hyperparameter sets: module defaults, non-default integer g's,
    # and a non-integer g's case (exercises every pow-specialization branch).
    for (m, gm, gp) in [(0.0, 0.0, 0.0), (0.05, 1.0, 2.0), (0.1, 1.5, 0.5)]:
        loss = asl_loss(logits, target, m=m, gm=gm, gp=gp)
        loss = jax.block_until_ready(loss)
        ref = asl_reference(logits, target, m=m, gm=gm, gp=gp)
        assert jnp.allclose(loss, ref, rtol=1e-5, atol=1e-5), (m, gm, gp, loss, ref)

    print("KERNEL_OK")
</pallas_src>

<mosaic_0001>
module attributes {stable_mosaic.version = 11 : i64} {
  func.func @asl_kernel(%arg0: i32, %arg1: i32, %arg2: memref<2x512xf32, #tpu.memory_space<vmem>>, %arg3: memref<1x512xf32, #tpu.memory_space<vmem>>, %arg4: memref<1x128xf32, #tpu.memory_space<vmem>>, %arg5: memref<1x512xf32, #tpu.memory_space<vmem>>) attributes {dimension_semantics = [#tpu.dimension_semantics<parallel>, #tpu.dimension_semantics<arbitrary>], iteration_bounds = array<i64: 2, 1>, scalar_prefetch = 0 : i64, scratch_operands = 1 : i64, tpu.core_type = #tpu.core_type<tc>, window_params = [{transform_indices = @transform_0, window_bounds = array<i64: 2, 512>}, {transform_indices = @transform_1, window_bounds = array<i64: 1, 512>}, {transform_indices = @transform_2, window_bounds = array<i64: 1, 128>}]} {
    %c0_i32 = arith.constant 0 : i32
    %0 = arith.cmpi eq, %arg1, %c0_i32 : i32
    %1 = arith.extui %0 : i1 to i32
    %c0_i32_0 = arith.constant 0 : i32
    %2 = arith.cmpi ne, %1, %c0_i32_0 : i32
    scf.if %2 {
      %cst_29 = arith.constant 0.000000e+00 : f32
      %69 = vector.broadcast %cst_29 : f32 to vector<1x512xf32>
      %c0_30 = arith.constant 0 : index
      %c0_31 = arith.constant 0 : index
      %70 = vector.load %arg5[%c0_30, %c0_31] : memref<1x512xf32, #tpu.memory_space<vmem>>, vector<1x512xf32>
      tpu.vector_store %arg5[%c0_30, %c0_31], %69 {strides = array<i32>} : memref<1x512xf32, #tpu.memory_space<vmem>>, vector<1x512xf32>,
    } else {
    }
    %c0 = arith.constant 0 : index
    %c0_1 = arith.constant 0 : index
    %3 = vector.load %arg2[%c0, %c0_1] : memref<2x512xf32, #tpu.memory_space<vmem>>, vector<1x512xf32>
    %c1 = arith.constant 1 : index
    %c0_2 = arith.constant 0 : index
    %4 = vector.load %arg2[%c1, %c0_2] : memref<2x512xf32, #tpu.memory_space<vmem>>, vector<1x512xf32>
    %c0_3 = arith.constant 0 : index
    %c0_4 = arith.constant 0 : index
    %5 = vector.load %arg3[%c0_3, %c0_4] : memref<1x512xf32, #tpu.memory_space<vmem>>, vector<1x512xf32>
    %cst = arith.constant 1.000000e+00 : f32
    %6 = vector.broadcast %cst : f32 to vector<1x512xf32>
    %7 = arith.subf %6, %5 : vector<1x512xf32>
    %8 = arith.subf %4, %3 : vector<1x512xf32>
    %9 = math.absf %8 : vector<1x512xf32>
    %cst_5 = arith.constant 0.000000e+00 : f32
    %10 = vector.broadcast %cst_5 : f32 to vector<1x512xf32>
    %11 = arith.subf %10, %9 : vector<1x512xf32>
    %12 = math.exp %11 : vector<1x512xf32>
    %cst_6 = arith.constant 1.000000e+00 : f32
    %13 = vector.broadcast %cst_6 : f32 to vector<1x512xf32>
    %14 = arith.addf %13, %12 : vector<1x512xf32>
    %cst_7 = arith.constant 1.000000e+00 : f32
    %15 = vector.broadcast %cst_7 : f32 to vector<1x512xf32>
    %16 = arith.divf %15, %14 : vector<1x512xf32>
    %cst_8 = arith.constant 0.000000e+00 : f32
    %17 = vector.broadcast %cst_8 : f32 to vector<1x512xf32>
    %18 = arith.cmpf oge, %8, %17 : vector<1x512xf32>
    %19 = arith.mulf %12, %16 : vector<1x512xf32>
    %20 = arith.select %18, %16, %19 : vector<1x512xi1>, vector<1x512xf32>
    %cst_9 = arith.constant 1.000000e+00 : f32
    %21 = vector.broadcast %cst_9 : f32 to vector<1x512xf32>
    %22 = arith.subf %21, %20 : vector<1x512xf32>
    %cst_10 = arith.constant 0.000000e+00 : f32
    %23 = vector.broadcast %cst_10 : f32 to vector<1x512xf32>
    %24 = arith.maximumf %8, %23 : vector<1x512xf32>
    %cst_11 = arith.constant 1.000000e+00 : f32
    %25 = vector.broadcast %cst_11 : f32 to vector<1x512xf32>
    %26 = arith.addf %25, %12 : vector<1x512xf32>
    %27 = math.log %26 : vector<1x512xf32>
    %28 = arith.addf %24, %27 : vector<1x512xf32>
    %cst_12 = arith.constant 1.000000e+00 : f32
    %29 = vector.broadcast %cst_12 : f32 to vector<1x512xf32>
    %30 = arith.mulf %5, %29 : vector<1x512xf32>
    %31 = arith.mulf %30, %28 : vector<1x512xf32>
    %cst_13 = arith.constant 0.000000e+00 : f32
    %32 = vector.broadcast %cst_13 : f32 to vector<1x512xf32>
    %33 = arith.cmpf ogt, %5, %32 : vector<1x512xf32>
    %cst_14 = arith.constant 0.000000e+00 : f32
    %34 = vector.broadcast %cst_14 : f32 to vector<1x512xf32>
    %35 = arith.select %33, %31, %34 : vector<1x512xi1>, vector<1x512xf32>
    %cst_15 = arith.constant 0.000000e+00 : f32
    %36 = vector.broadcast %cst_15 : f32 to vector<1x512xf32>
    %37 = arith.subf %22, %36 : vector<1x512xf32>
    %cst_16 = arith.constant 0.000000e+00 : f32
    %38 = vector.broadcast %cst_16 : f32 to vector<1x512xf32>
    %39 = arith.maximumf %37, %38 : vector<1x512xf32>
    %cst_17 = arith.constant 0.000000e+00 : f32
    %40 = vector.broadcast %cst_17 : f32 to vector<1x512xf32>
    %41 = arith.subf %40, %7 : vector<1x512xf32>
    %cst_18 = arith.constant 1.000000e+00 : f32
    %42 = vector.broadcast %cst_18 : f32 to vector<1x512xf32>
    %43 = arith.mulf %41, %42 : vector<1x512xf32>
    %cst_19 = arith.constant 1.000000e+00 : f32
    %44 = vector.broadcast %cst_19 : f32 to vector<1x512xf32>
    %45 = arith.subf %44, %39 : vector<1x512xf32>
    %46 = math.log %45 : vector<1x512xf32>
    %47 = arith.mulf %43, %46 : vector<1x512xf32>
    %cst_20 = arith.constant 0.000000e+00 : f32
    %48 = vector.broadcast %cst_20 : f32 to vector<1x512xf32>
    %49 = arith.cmpf ogt, %7, %48 : vector<1x512xf32>
    %cst_21 = arith.constant 0.000000e+00 : f32
    %50 = vector.broadcast %cst_21 : f32 to vector<1x512xf32>
    %51 = arith.select %49, %47, %50 : vector<1x512xi1>, vector<1x512xf32>
    %c1_i32 = arith.constant 1 : i32
    %52 = arith.muli %arg0, %c1_i32 : i32
    %53 = arith.addi %52, %arg1 : i32
    %c512_i32 = arith.constant 512 : i32
    %54 = arith.muli %53, %c512_i32 : i32
    %55 = tpu.iota {dimensions = array<i32: 1>} : vector<1x512xi32>
    %56 = vector.broadcast %54 : i32 to vector<1x512xi32>
    %57 = arith.addi %56, %55 : vector<1x512xi32>
    %c0_22 = arith.constant 0 : index
    %c0_23 = arith.constant 0 : index
    %58 = vector.load %arg5[%c0_22, %c0_23] : memref<1x512xf32, #tpu.memory_space<vmem>>, vector<1x512xf32>
    %c8_i32 = arith.constant 8 : i32
    %59 = vector.broadcast %c8_i32 : i32 to vector<1x512xi32>
    %60 = arith.cmpi slt, %57, %59 : vector<1x512xi32>
    %61 = arith.addf %35, %51 : vector<1x512xf32>
    %cst_24 = arith.constant 0.000000e+00 : f32
    %62 = vector.broadcast %cst_24 : f32 to vector<1x512xf32>
    %63 = arith.select %60, %61, %62 : vector<1x512xi1>, vector<1x512xf32>
    %64 = arith.addf %58, %63 : vector<1x512xf32>
    %c0_25 = arith.constant 0 : index
    %c0_26 = arith.constant 0 : index
    %65 = vector.load %arg5[%c0_25, %c0_26] : memref<1x512xf32, #tpu.memory_space<vmem>>, vector<1x512xf32>
    tpu.vector_store %arg5[%c0_25, %c0_26], %64 {strides = array<i32>} : memref<1x512xf32, #tpu.memory_space<vmem>>, vector<1x512xf32>,
    %c0_i32_27 = arith.constant 0 : i32
    %66 = arith.cmpi eq, %arg1, %c0_i32_27 : i32
    %67 = arith.extui %66 : i1 to i32
    %c0_i32_28 = arith.constant 0 : i32
    %68 = arith.cmpi ne, %67, %c0_i32_28 : i32
    scf.if %68 {
      %c0_29 = arith.constant 0 : index
      %c0_30 = arith.constant 0 : index
      %69 = vector.load %arg5[%c0_29, %c0_30] : memref<1x512xf32, #tpu.memory_space<vmem>>, vector<1x512xf32>
      %70 = vector.shape_cast %69 : vector<1x512xf32> to vector<1x1x512xf32>
      %cst_31 = arith.constant dense<0.000000e+00> : vector<1xf32>
      %71 = vector.multi_reduction <add>, %70, %cst_31 [1, 2] : vector<1x1x512xf32> to vector<1xf32>
      %72 = vector.shape_cast %71 : vector<1xf32> to vector<1x1x1xf32>
      %73 = vector.extract %72[0, 0, 0] : f32 from vector<1x1x1xf32>
      %cst_32 = arith.constant 1.000000e+00 : f32
      %74 = vector.broadcast %cst_32 : f32 to vector<1x128xf32>
      %75 = vector.broadcast %73 : f32 to vector<1x128xf32>
      %76 = arith.mulf %75, %74 : vector<1x128xf32>
      %c0_33 = arith.constant 0 : index
      %c0_34 = arith.constant 0 : index
      %77 = vector.load %arg4[%c0_33, %c0_34] : memref<1x128xf32, #tpu.memory_space<vmem>>, vector<1x128xf32>
      tpu.vector_store %arg4[%c0_33, %c0_34], %76 {strides = array<i32>} : memref<1x128xf32, #tpu.memory_space<vmem>>, vector<1x128xf32>,
    } else {
    }
    return
  }
  func.func @transform_0(%arg0: i32, %arg1: i32) -> (i32, i32) {
    %c1_i32 = arith.constant 1 : i32
    %0 = arith.muli %arg0, %c1_i32 : i32
    %1 = arith.addi %0, %arg1 : i32
    %c0_i32 = arith.constant 0 : i32
    %c0_i32_0 = arith.constant 0 : i32
    return %c0_i32, %1 : i32, i32
  }
  func.func @transform_1(%arg0: i32, %arg1: i32) -> (i32, i32) {
    %c1_i32 = arith.constant 1 : i32
    %0 = arith.muli %arg0, %c1_i32 : i32
    %1 = arith.addi %0, %arg1 : i32
    %c0_i32 = arith.constant 0 : i32
    %c0_i32_0 = arith.constant 0 : i32
    return %c0_i32, %1 : i32, i32
  }
  func.func @transform_2(%arg0: i32, %arg1: i32) -> (i32, i32) {
    %c0_i32 = arith.constant 0 : i32
    %c0_i32_0 = arith.constant 0 : i32
    return %c0_i32, %arg0 : i32, i32
  }
}

</mosaic_0001>

<bundles_post_ra>
// kernel: tpu_custom_call.1
= control target key start
LH: loop header
LB: loop body
LE: loop exit
PB: predicated region body
PF: predicated region fallthrough
CT: control target
= control target key end

     0   :  { %7 = vsyncpa [#allocation4], 0  ;;  %s935_s0 = inlined_call_operand.hbm [shape: f32[2,1024], index: 0, kind: input, shape index: {}]   ;;  %s936_s1 = inlined_call_operand.hbm [shape: f32[1,1024], index: 1, kind: input, shape index: {}]   ;;  %s937_s2 = inlined_call_operand.hbm [shape: f32[1,256], index: 2, kind: output, shape index: {}]  }
   0x1   :  { %9 = vsyncpa [#allocation4 + $0x1], 0 }
   0x2   :  { %10 = vsyncpa [#allocation7], 0 }
   0x3   :  { %12 = vsyncpa [#allocation7 + $0x1], 0 }
   0x4   :  { %13 = vsyncpa [#allocation5], 0 }
   0x5   :  { %15 = vsyncpa [#allocation5 + $0x1], 0  ;;  %s755_s9 = smov 0   ;;  %s757_s10 = smov 0  }
   0x6   :  { %s759_s11 = smov 0   ;;  %s761_s12 = smov 0  }
   0x7   :  { %s763_s13 = smov 0   ;;  %s765_s14 = smov 0  }
   0x8 LB: > { %s494_s15 = sadd.s32 4294967295, %s733_s14   ;;  %s495_s16 = sadd.s32 4294967294, %s733_s14   ;;  %s733_s14 = sphi %s765_s14, %s21_s14   ;;  %s729_s13 = sphi %s763_s13, %s951_s13   ;;  %s725_s12 = sphi %s761_s12, %s950_s12   ;;  %s721_s11 = sphi %s759_s11, %s949_s11   ;;  %s717_s10 = sphi %s757_s10, %s948_s10   ;;  %s713_s9 = sphi %s755_s9, %s947_s9  }
   0x9   : > { %s33_s17 = sadd.s32 1, %s729_s13  ;;  %s42_s18 = sadd.s32 1, %s721_s11 }
   0xa   : > { %p35_p0 = scmp.ge.s32.totalorder %s33_s17, 2  ;;  %p49_p1 = scmp.ne.s32.totalorder %s721_s11, %s717_s10 }
   0xb   : > { %p50_p2 = scmp.eq.s32.totalorder %s733_s14, 0  ;;  %p55_p3 = scmp.ne.s32.totalorder %s717_s10, %s713_s9 }
   0xc   : > { %s953_s17 = smov (%p35_p0, %s33_s17), 0  ;;  %p56_p5 = scmp.eq.s32.totalorder %s494_s15, 0 }
   0xd   : > { %p796_p4 = por %p50_p2, %p49_p1  ;;  %s39_s20 = ssub.s32 %s729_s13, %s953_s17 }
   0xe   : > { %p107_p6 = scmp.eq.s32.totalorder %s494_s15, 1  ;;  %p40_p7 = scmp.eq.s32.totalorder %s39_s20, 0 }
   0xf   : > { %p802_p8 = por %p56_p5, %p55_p3  ;;  %p113_p10 = scmp.eq.s32.totalorder %s495_s16, 1 }
  0x10   : > { %p806_p9 = por %p107_p6, %p49_p1  ;;  %p533_p13 = scmp.lt.s32.totalorder %s733_s14, 2 }
  0x11   : > { %s811_s23 = scalar_select %p40_p7, %s721_s11, %s42_s18  }
  0x12   : > { %p813_p11 = por %p113_p10, %p55_p3  ;;  %s820_s25 = sand.u32 1, %s721_s11  }
  0x13   : > { %s498_s26 = sshll.u32 %s820_s25, 3  ;;  %s512_s27 = sshll.u32 %s729_s13, 7 }
  0x14   : > { %s144_s30 = scalar_lea.hbm %s935_s0, %s512_s27  ;;  %s137_s3 = scalar_lea.vmem [#allocation3], %s498_s26 }
  0x15   : > { %s146_s4 = sshll.u32 %s137_s3, 4  ;;  %p829_p0 = pnand %p533_p13, %p796_p4  ;;  %s147_s4 = int_to_ptr.vmem [resolvable:$true] %s146_s4 }
  0x16   : > { %p504_p1 = scmp.ge.s32.totalorder %s733_s14, 1  ;;  %p171_p2 = scmp.lt.s32.totalorder %s733_s14, 3 }
  0x17   : > { %s134_s6 = scalar_lea.sflag [#allocation4], %s820_s25  ;;  %p595_p3 = pneg %p829_p0 }
  0x18   : > { %s606_s7 = scalar_lea.vmem %s147_s4, 128  ;;  %s735_s8 = smov [#allocation3]  }
  0x19   : > { %p607_p5 = scmp.ne.s32.totalorder %s147_s4, %s606_s7  ;;  %s611_s15 = sshll.u32 %s735_s8, 4  ;;  %s612_s15 = int_to_ptr.vmem [resolvable:$false] %s611_s15 }
  0x1a   : > { %s613_s16 = scalar_lea.vmem %s612_s15, 256  ;;  %p614_p4 = scmp.lt.s32.totalorder %s147_s4, %s612_s15 }
  0x1b   : > { %p609_p6 = pnand %p607_p5, %p595_p3  ;;  %p615_p10 = scmp.lt.s32.totalorder %s613_s16, %s606_s7 }
  0x1d   : > { %p610_p7 = pneg %p609_p6  ;;  %p616_p13 = por %p615_p10, %p614_p4 }
  0x1f   : > { %p617_p12 = pnand %p616_p13, %p610_p7 }
  0x21   : > { %620 = shalt.err (!%p617_p12)
}
  0x22   : > { %525 = dma.hbm_to_vmem [thread:$0]  (!%p829_p0), %s144_s30, 128, %s147_s4, %s134_s6  }
  0x23   : > { %p847_p5 = pnand %p504_p1, %p171_p2  ;;  %s501_s19 = sshll.u32 %s820_s25, 2 }
  0x24   : > { %s513_s20 = sshll.u32 %s729_s13, 6  ;;  %s157_s29 = scalar_lea.vmem [#allocation6], %s501_s19 }
  0x25   : > { %s164_s28 = scalar_lea.hbm %s936_s1, %s513_s20  ;;  %s166_s3 = sshll.u32 %s157_s29, 4  ;;  %s167_s3 = int_to_ptr.vmem [resolvable:$true] %s166_s3 }
  0x26   : > { %s154_s7 = scalar_lea.sflag [#allocation7], %s820_s25  ;;  %s634_s8 = scalar_lea.vmem %s167_s3, 64 }
  0x27   : > { %p635_p12 = scmp.ne.s32.totalorder %s167_s3, %s634_s8  ;;  %s736_s30 = smov [#allocation6]  }
  0x28   : > { %s639_s4 = sshll.u32 %s736_s30, 4  ;;  %s640_s4 = int_to_ptr.vmem [resolvable:$false] %s639_s4 }
  0x29   : > { %p637_p6 = pnand %p635_p12, %p595_p3  ;;  %s641_s6 = scalar_lea.vmem %s640_s4, 128 }
  0x2a   : > { %p642_p1 = scmp.lt.s32.totalorder %s167_s3, %s640_s4  ;;  %p643_p2 = scmp.lt.s32.totalorder %s641_s6, %s634_s8 }
  0x2b   : > { %p638_p7 = pneg %p637_p6 }
  0x2c   : > { %p644_p4 = por %p643_p2, %p642_p1 }
  0x2e   : > { %p645_p10 = pnand %p644_p4, %p638_p7 }
  0x30   : > { %648 = shalt.err (!%p645_p10)
}
  0x31   : > { %528 = dma.hbm_to_vmem [thread:$0]  (!%p829_p0), %s164_s28, 64, %s167_s3, %s154_s7  }
  0x32   : > { %175 = sbr.rel (%p847_p5) target bundleno = 373 (0x175), region = 28  ;;  %s865_s25 = sand.u32 (!%p847_p5), 1, %s717_s10  }
  0x33   : > { %s505_s15 = sshll.u32 (!%p847_p5), %s865_s25, 3  ;;  %s178_s16 = scalar_lea.sflag (!%p847_p5), [#allocation4], %s865_s25 }
  0x34   : > { %s181_s19 = scalar_lea.vmem (!%p847_p5), [#allocation3], %s505_s15 }
  0x37   : > { %700 = dma.done.wait (%p802_p8), %s178_s16, 128  }
  0x38   : > { %702 = vsyncadd (%p802_p8), %s178_s16, 4294967168  ;;  %s506_s5 = sshll.u32 %s865_s25, 2  ;;  %s187_s18 = scalar_lea.sflag [#allocation7], %s865_s25 }
  0x39   : > { %s190_s20 = scalar_lea.vmem [#allocation6], %s506_s5 }
  0x3a   : > { %704 = dma.done.wait (%p802_p8), %s187_s18, 64  }
  0x3b   : > { %706 = vsyncadd (%p802_p8), %s187_s18, 4294967232  ;;  %v223_v0 = vlaneseq  ;;  %v737_v2 = vmov 0.0   ;;  %v228_v3 = vld [vmem:[%s181_s19] ss:$2 sm:$0xf]  ;;  %s508_s21 = sshll.u32 %s725_s12, 9 }
  0x3c   : > { %v507_v4 = vld [vmem:[%s181_s19 + $0x1] ss:$2 sm:$0xf]  ;;  %v231_v20 = vld [vmem:[%s190_s20] sm:$0xf]  ;;  %v267_v25 = vstv %s508_s21  ;;  %vm363_vm8 = vcmask 1040384  }
  0x3d   : > { %vm879_vm0 = vcmp.lt.s32.totalorder %v223_v0, 512  ;;  %v233_v5 = vsub.f32 %v507_v4, %v228_v3  ;;  %v263_v21 = vand.u32 127, %v223_v0  ;;  %v232_v22 = vsub.f32 1.0, %v231_v20  ;;  %s214_s26 = scalar_lea.vmem [#allocation8], %s865_s25  ;;  %s509_s28 = sshll.u32 %s725_s12, 4 }
  0x3e   : > { %227 = vst.msk [vmem:[#allocation2] sm:$0xf] %vm879_vm0, %v737_v2  ;;  %vm250_vm2 = vcmp.gt.f32.partialorder %v231_v20, 0.0  ;;  %v280_v31 = vshrl.u32 %v223_v0, 7  ;;  %v738_v33 = vmov 1966171168   ;;  %s393_s8 = scalar_lea.hbm %s937_s2, %s509_s28 }
  0x3f   : > { %v234_v6 = vand.u32 2147483647, %v233_v5  ;;  %vm241_vm1 = vcmp.ge.f32.partialorder %v233_v5, 0.0  ;;  %v245_v18 = vmax.f32 %v233_v5, 0.0  ;;  %v264_v24 = vadd.s32 128, %v263_v21  ;;  %s395_s27 = sshll.u32 %s214_s26, 4  ;;  %s890_s27 = int_to_ptr.vmem [resolvable:$true] %s395_s27 }
  0x40   : > { %v253_v27 = vsub.f32 0.0, %v232_v22  ;;  %v265_v28 = vadd.s32 256, %v263_v21  ;;  %v266_v29 = vadd.s32 384, %v263_v21  ;;  %v310_v34 = vunpack.c.l.s4 %v738_v33  ;;  %s383_s30 = scalar_lea.sflag [#allocation5], %s865_s25  ;;  %s649_s4 = scalar_lea.vmem %s890_s27, 16 }
  0x41   : > { %v235_v7 = vsub.f32 0.0, %v234_v6  ;;  %vm258_vm3 = vcmp.gt.f32.partialorder %v232_v22, 0.0  ;;  %v268_v35 = vadd.s32 %v267_v25, %v263_v21  ;;  %v269_v36 = vadd.s32 %v267_v25, %v264_v24  ;;  %p650_p8 = scmp.ne.s32.totalorder %s890_s27, %s649_s4  ;;  %s739_s6 = smov [#allocation8]  }
  0x42   : > { %v270_v39 = vadd.s32 %v267_v25, %v265_v28  ;;  %v271_v40 = vadd.s32 %v267_v25, %v266_v29  ;;  %v281_v41 = vsub.s32 0, %v280_v31  ;;  %v285_v42 = vsub.s32 1, %v280_v31  ;;  %s653_s12 = sshll.u32 %s739_s6, 4  ;;  %s654_s12 = int_to_ptr.vmem [resolvable:$false] %s653_s12 }
  0x43   : > { %v236_v8 = vmul.f32 1.442695, %v235_v7  ;;  %v289_v43 = vsub.s32 2, %v280_v31  ;;  %v293_v44 = vsub.s32 3, %v280_v31  ;;  %v311_v46 = vunpack.c.0.s8 %v310_v34  ;;  %p651_p0 = pnand %p650_p8, %p806_p9  ;;  %s655_s15 = scalar_lea.vmem %s654_s12, 32 }
  0x44   : > { %vm273_vm4 = vcmp.lt.s32.totalorder %v268_v35, 8  ;;  %vm274_vm5 = vcmp.lt.s32.totalorder %v269_v36, 8  ;;  %vm275_vm6 = vcmp.lt.s32.totalorder %v270_v39, 8  ;;  %vm276_vm7 = vcmp.lt.s32.totalorder %v271_v40, 8  ;;  %p656_p13 = scmp.lt.s32.totalorder %s890_s27, %s654_s12  ;;  %p657_p5 = scmp.lt.s32.totalorder %s655_s15, %s649_s4 }
  0x45   : > { %585 = vpow2.f32 %v236_v8  ;;  %v314_v52 = vsub.s32 %v311_v46, %v280_v31  ;;  %v272_v62 = vld [vmem:[#allocation2] sm:$0xf]  ;;  %p652_p3 = pneg %p651_p0 }
  0x46   : > { %p658_p12 = por %p657_p5, %p656_p13 }
  0x48   : > { %p659_p6 = pnand %p658_p12, %p652_p3 }
  0x52   : > { %v586_v9 = vpop.eup %585 }
  0x53   : > { %v238_v10 = vadd.f32 1.0, %v586_v9 }
  0x55   : > { %587 = vrcp.f32 %v238_v10 }
  0x56   : > { %589 = vlog2.f32 %v238_v10 }
  0x62   : > { %v588_v11 = vpop.eup %587 }
  0x63   : > { %v242_v12 = vmul.f32 %v588_v11, %v586_v9  ;;  %v590_v17 = vpop.eup %589 }
  0x64   : > { %v247_v19 = vmul.f32 0.6931472, %v590_v17 }
  0x65   : > { %v243_v13 = vsel %vm241_vm1, %v588_v11, %v242_v12 }
  0x66   : > { %v244_v14 = vsub.f32 1.0, %v243_v13  ;;  %v248_v23 = vadd.f32 %v247_v19, %v245_v18 }
  0x68   : > { %v252_v15 = vmax.f32 %v244_v14, 0.0  ;;  %v249_v26 = vmul.f32 %v248_v23, %v231_v20 }
  0x6a   : > { %v254_v16 = vsub.f32 1.0, %v252_v15  ;;  %v251_v37 = vsel %vm250_vm2, %v249_v26, 0.0 }
  0x6c   : > { %591 = vlog2.f32 %v254_v16 }
  0x79   : > { %v592_v30 = vpop.eup %591 }
  0x7a   : > { %v256_v32 = vmul.f32 0.6931472, %v592_v30 }
  0x7c   : > { %v257_v38 = vmul.f32 %v256_v32, %v253_v27 }
  0x7e   : > { %v259_v45 = vsel %vm258_vm3, %v257_v38, 0.0 }
  0x7f   : > { %v277_v47 = vadd.f32 %v259_v45, %v251_v37 }
  0x81   : > { %v282_v48 = vrot.slane %v277_v47, %v281_v41  ;;  %v286_v49 = vrot.slane %v277_v47, %v285_v42  ;;  %v290_v50 = vrot.slane %v277_v47, %v289_v43  ;;  %v294_v51 = vrot.slane %v277_v47, %v293_v44 }
  0x83   : > { %v299_v53 = vsel %vm273_vm4, %v282_v48, 0.0  ;;  %v300_v54 = vsel %vm274_vm5, %v286_v49, 0.0  ;;  %v301_v55 = vsel %vm275_vm6, %v290_v50, 0.0  ;;  %v302_v56 = vsel %vm276_vm7, %v294_v51, 0.0 }
  0x84   : > { %v307_v57 = vcombine.low %v299_v53, %v300_v54  ;;  %v308_v58 = vcombine.low %v301_v55, %v302_v56 }
  0x86   : > { %v315_v59 = vrot.slane %v307_v57, %v314_v52  ;;  %v322_v60 = vrot.slane %v308_v58, %v314_v52 }
  0x88   : > { %v323_v61 = vcombine.low %v315_v59, %v322_v60 }
  0x8a   : > { %v330_v63 = vrot.slane %v323_v61, %v314_v52 }
  0x8c   : > { %v332_v0 = vadd.f32 %v330_v63, %v272_v62 }
  0x8e   : > { %337 = vst.msk [vmem:[#allocation2] sm:$0xf] %vm879_vm0, %v332_v0 }
  0x95   : > { %v341_v2 = vld [vmem:[#allocation2] sm:$0xf] }
  0x96   : > { %v346_v3 = vrot.slane %v341_v2, %v281_v41  ;;  %v350_v4 = vrot.slane %v341_v2, %v285_v42  ;;  %v354_v5 = vrot.slane %v341_v2, %v289_v43  ;;  %v358_v6 = vrot.slane %v341_v2, %v293_v44 }
  0x98   : > { %v364_v7 = vsel %vm363_vm8, %v346_v3, 0.0  ;;  %v365_v8 = vsel %vm363_vm8, %v350_v4, 0.0  ;;  %v367_v9 = vsel %vm363_vm8, %v354_v5, 0.0  ;;  %v369_v11 = vsel %vm363_vm8, %v358_v6, 0.0 }
  0x99   : > { %v366_v10 = vadd.f32 %v365_v8, %v364_v7 }
  0x9b   : > { %v368_v12 = vadd.f32 %v367_v9, %v366_v10 }
  0x9d   : > { %v370_v13 = vadd.f32 %v369_v11, %v368_v12 }
  0x9f   : > { %371 = vadd.xlane.f32.xlu0 %v370_v13 }
 0x128   : > { %v372_v14 = vpop.xlane.xlu0 %371 }
 0x129   : > { %v373_v1 = vrot.slane %v372_v14, 4 }
 0x12b   : > { %v374_v15 = vadd.f32 %v373_v1, %v372_v14 }
 0x12d   : > { %v375_v16 = vrot.slane %v374_v15, 2 }
 0x12f   : > { %v376_v17 = vadd.f32 %v375_v16, %v374_v15 }
 0x131   : > { %v377_v18 = vrot.slane %v376_v17, 1 }
 0x133   : > { %v378_v19 = vadd.f32 %v377_v18, %v376_v17 }
 0x135   : > { %514 = vpush %v378_v19 }
 0x166   : > { %s515_s29 = spop %514 }
 0x167   : > { %v380_v20 = vstv %s515_s29 }
 0x168   : > { %381 = vst [vmem:[%s214_s26] sm:$0x1] %v380_v20 }
 0x169   : > { %662 = shalt.err (!%p659_p6)
}
 0x16a   : > { %s663_s16 = scalar_lea.hbm %s393_s8, 16  ;;  %s667_s5 = scalar_lea.hbm %s937_s2, 32 }
 0x16b   : > { %p664_p7 = scmp.ne.s32.totalorder %s393_s8, %s663_s16  ;;  %p668_p4 = scmp.lt.s32.totalorder %s393_s8, %s937_s2 }
 0x16c   : > { %p669_p10 = scmp.lt.s32.totalorder %s667_s5, %s663_s16 }
 0x16d   : > { %p665_p1 = pnand %p664_p7, %p806_p9 }
 0x16e   : > { %p670_p8 = por %p669_p10, %p668_p4 }
 0x16f   : > { %p666_p2 = pneg %p665_p1 }
 0x171   : > { %p671_p0 = pnand %p670_p8, %p666_p2 }
 0x173   : > { %674 = shalt.err (!%p671_p0)
}
 0x174   : > { %520 = dma.vmem_to_hbm [thread:$0]  (%p806_p9), %s890_s27, 16, %s393_s8, %s383_s30  }
 0x175 PF: > { %s407_s21 = sand.u32 1, %s713_s9   ;;  %p946_p3 = scmp.ge.s32.totalorder %s733_s14, 2 }
 0x176   : > { %s408_s26 = scalar_lea.sflag [#allocation5], %s407_s21 }
 0x177   : > { %p530_p13 = pnand %p946_p3, %p813_p11 }
 0x179   : > { %p531_p5 = pneg %p530_p13 }
 0x17b   : > { %708 = dma.done.wait (%p531_p5), %s408_s26, 16  }
 0x17c   : > { %710 = vsyncadd (%p531_p5), %s408_s26, 4294967280  ;;  %s21_s14 = sadd.s32 1, %s733_s14   ;;  %s947_s9 = smov %s717_s10 }
 0x17d   : > { %p18_p12 = scmp.ge.s32.totalorder %s21_s14, 4   ;;  %s948_s10 = smov %s721_s11 }
 0x17e   : > { %s949_s11 = smov %s811_s23  ;;  %s950_s12 = smov %s729_s13 }
 0x17f   : > { %s951_s13 = smov %s953_s17  ;;  %20 = sbr.rel (!%p18_p12) target bundleno = 8 (0x8), region = 95 }
 0x184   :  { %412 = vsyncpa [#allocation4], 1 }
 0x185   :  { %414 = vsyncpa [#allocation4 + $0x1], 1 }
 0x186   :  { %415 = vsyncpa [#allocation7], 1 }
 0x187   :  { %417 = vsyncpa [#allocation7 + $0x1], 1 }
 0x188   :  { %418 = vsyncpa [#allocation5], 1 }
 0x189   :  { %420 = vsyncpa [#allocation5 + $0x1], 1 }

</bundles_post_ra>
